<compile_context>
chip_gen: v5e
topology: v5e:2x2
jax: 0.10.0
libtpu: 0.0.40
codegen_flags: <defaults>
</compile_context>

<pallas_src>
import jax
import jax.numpy as jnp
from jax.experimental import pallas as pl
from jax.experimental.pallas import tpu as pltpu


SIG_LOW = 0.0
SIG_HIGH = 5.5
LANE = 128


def mf_kernel(u_ref, i_ref, bias_ref, out_ref):
    # u_ref / i_ref: (D, BB) f32, batch on lanes. bias_ref/out_ref: (1, BB).
    u = u_ref[...]
    v = i_ref[...]
    dot = jnp.sum(u * v, axis=0, keepdims=True)          # (1, BB) sublane reduce
    x = dot + bias_ref[...]                               # fused user+item+offset bias
    y = jax.nn.sigmoid(x) * (SIG_HIGH - SIG_LOW) + SIG_LOW
    out_ref[...] = y.astype(out_ref.dtype)


def mf_advanced_forward(user_idx, item_idx, user_emb_w, item_emb_w,
                        user_bias, item_bias, offset, *, block_b=1024):
    """Pallas implementation of MFAdvanced.forward (bias=True, sigmoid=True)."""
    B = user_idx.shape[0]
    D = user_emb_w.shape[1]

    # --- tiling: batch on lanes, block_b a multiple of 128 ---
    block_b = max(LANE, (block_b // LANE) * LANE)
    padded_B = pl.cdiv(B, LANE) * LANE
    block_b = min(block_b, padded_B)
    padded_B = pl.cdiv(padded_B, block_b) * block_b
    pad = padded_B - B

    u_idx = jnp.pad(user_idx.astype(jnp.int32), (0, pad))
    i_idx = jnp.pad(item_idx.astype(jnp.int32), (0, pad))

    # --- glue: embedding gathers (XLA indexing), laid out lane-major (D, B) ---
    u_rows_t = user_emb_w[u_idx].T                        # (D, padded_B) f32
    i_rows_t = item_emb_w[i_idx].T                        # (D, padded_B) f32

    # --- glue: fold all bias terms into one lane-dense row ---
    bias_row = (user_bias[u_idx] + item_bias[i_idx] + offset[0])[None, :]  # (1, padded_B)

    grid = (padded_B // block_b,)

    out = pl.pallas_call(
        mf_kernel,
        out_shape=jax.ShapeDtypeStruct((1, padded_B), jnp.float32),
        grid=grid,
        in_specs=[
            pl.BlockSpec((D, block_b), lambda i: (0, i)),   # user rows (lane-major)
            pl.BlockSpec((D, block_b), lambda i: (0, i)),   # item rows (lane-major)
            pl.BlockSpec((1, block_b), lambda i: (0, i)),   # fused bias row
        ],
        out_specs=pl.BlockSpec((1, block_b), lambda i: (0, i)),
        compiler_params=pltpu.CompilerParams(
            dimension_semantics=("parallel",)),
    )(u_rows_t, i_rows_t, bias_row)

    return out[0, :B]                                       # (B,)


def mf_advanced_reference(user_idx, item_idx, user_emb_w, item_emb_w,
                          user_bias, item_bias, offset):
    """Pure-JAX reference matching the PyTorch module (bias=True, sigmoid=True)."""
    u = user_emb_w[user_idx]
    v = item_emb_w[item_idx]
    x = jnp.sum(u * v, axis=1)
    x = x + user_bias[user_idx] + item_bias[item_idx] + offset[0]
    return jax.nn.sigmoid(x) * (SIG_HIGH - SIG_LOW) + SIG_LOW


if __name__ == "__main__":
    num_users, num_items, emb_dim = 50, 40, 32
    B = 64

    key = jax.random.PRNGKey(0)
    k_ue, k_ie, k_u, k_i = jax.random.split(key, 4)

    # Parameter init matching MFAdvanced.__init__(init=True, bias=True):
    #   embeddings ~ U(0, 0.05); biases and offset are zeros.
    user_emb_w = jax.random.uniform(k_ue, (num_users, emb_dim),
                                    dtype=jnp.float32, minval=0.0, maxval=0.05)
    item_emb_w = jax.random.uniform(k_ie, (num_items, emb_dim),
                                    dtype=jnp.float32, minval=0.0, maxval=0.05)
    user_bias = jnp.zeros((num_users,), dtype=jnp.float32)
    item_bias = jnp.zeros((num_items,), dtype=jnp.float32)
    offset = jnp.zeros((1,), dtype=jnp.float32)

    user_idx = jax.random.randint(k_u, (B,), 0, num_users, dtype=jnp.int32)
    item_idx = jax.random.randint(k_i, (B,), 0, num_items, dtype=jnp.int32)

    out = mf_advanced_forward(user_idx, item_idx, user_emb_w, item_emb_w,
                              user_bias, item_bias, offset)
    out = jax.block_until_ready(out)

    ref = mf_advanced_reference(user_idx, item_idx, user_emb_w, item_emb_w,
                                user_bias, item_bias, offset)
    ref = jax.block_until_ready(ref)

    assert out.shape == (B,)
    assert jnp.allclose(out, ref, atol=1e-5, rtol=1e-5), "mismatch vs reference"
    print("KERNEL_OK")
</pallas_src>

<mosaic_0001>
module attributes {stable_mosaic.version = 11 : i64} {
  func.func @mf_kernel(%arg0: i32, %arg1: memref<32x128xf32, #tpu.memory_space<vmem>>, %arg2: memref<32x128xf32, #tpu.memory_space<vmem>>, %arg3: memref<1x128xf32, #tpu.memory_space<vmem>>, %arg4: memref<1x128xf32, #tpu.memory_space<vmem>>) attributes {dimension_semantics = [#tpu.dimension_semantics<parallel>], iteration_bounds = array<i64: 1>, scalar_prefetch = 0 : i64, scratch_operands = 0 : i64, tpu.core_type = #tpu.core_type<tc>, window_params = [{transform_indices = @transform_0, window_bounds = array<i64: 32, 128>}, {transform_indices = @transform_1, window_bounds = array<i64: 32, 128>}, {transform_indices = @transform_2, window_bounds = array<i64: 1, 128>}, {transform_indices = @transform_3, window_bounds = array<i64: 1, 128>}]} {
    %c0 = arith.constant 0 : index
    %c0_0 = arith.constant 0 : index
    %0 = vector.load %arg1[%c0, %c0_0] : memref<32x128xf32, #tpu.memory_space<vmem>>, vector<32x128xf32>
    %c0_1 = arith.constant 0 : index
    %c0_2 = arith.constant 0 : index
    %1 = vector.load %arg2[%c0_1, %c0_2] : memref<32x128xf32, #tpu.memory_space<vmem>>, vector<32x128xf32>
    %2 = arith.mulf %0, %1 : vector<32x128xf32>
    %cst = arith.constant dense<0.000000e+00> : vector<128xf32>
    %3 = vector.multi_reduction <add>, %2, %cst [0] : vector<32x128xf32> to vector<128xf32>
    %4 = vector.shape_cast %3 : vector<128xf32> to vector<1x128xf32>
    %c0_3 = arith.constant 0 : index
    %c0_4 = arith.constant 0 : index
    %5 = vector.load %arg3[%c0_3, %c0_4] : memref<1x128xf32, #tpu.memory_space<vmem>>, vector<1x128xf32>
    %6 = arith.addf %4, %5 : vector<1x128xf32>
    %7 = arith.negf %6 : vector<1x128xf32>
    %8 = math.exp %7 : vector<1x128xf32>
    %cst_5 = arith.constant 1.000000e+00 : f32
    %9 = vector.broadcast %cst_5 : f32 to vector<1x128xf32>
    %10 = arith.addf %9, %8 : vector<1x128xf32>
    %11 = arith.divf %9, %10 : vector<1x128xf32>
    %cst_6 = arith.constant 5.500000e+00 : f32
    %12 = vector.broadcast %cst_6 : f32 to vector<1x128xf32>
    %13 = arith.mulf %11, %12 : vector<1x128xf32>
    %cst_7 = arith.constant 0.000000e+00 : f32
    %14 = vector.broadcast %cst_7 : f32 to vector<1x128xf32>
    %15 = arith.addf %13, %14 : vector<1x128xf32>
    %c0_8 = arith.constant 0 : index
    %c0_9 = arith.constant 0 : index
    %16 = vector.load %arg4[%c0_8, %c0_9] : memref<1x128xf32, #tpu.memory_space<vmem>>, vector<1x128xf32>
    tpu.vector_store %arg4[%c0_8, %c0_9], %15 {strides = array<i32>} : memref<1x128xf32, #tpu.memory_space<vmem>>, vector<1x128xf32>,
    return
  }
  func.func @transform_0(%arg0: i32) -> (i32, i32) {
    %c0_i32 = arith.constant 0 : i32
    %c0_i32_0 = arith.constant 0 : i32
    return %c0_i32, %arg0 : i32, i32
  }
  func.func @transform_1(%arg0: i32) -> (i32, i32) {
    %c0_i32 = arith.constant 0 : i32
    %c0_i32_0 = arith.constant 0 : i32
    return %c0_i32, %arg0 : i32, i32
  }
  func.func @transform_2(%arg0: i32) -> (i32, i32) {
    %c0_i32 = arith.constant 0 : i32
    %c0_i32_0 = arith.constant 0 : i32
    return %c0_i32, %arg0 : i32, i32
  }
  func.func @transform_3(%arg0: i32) -> (i32, i32) {
    %c0_i32 = arith.constant 0 : i32
    %c0_i32_0 = arith.constant 0 : i32
    return %c0_i32, %arg0 : i32, i32
  }
}

</mosaic_0001>

<bundles_post_ra>
// kernel: tpu_custom_call.1
= control target key start
LH: loop header
LB: loop body
LE: loop exit
PB: predicated region body
PF: predicated region fallthrough
CT: control target
= control target key end

     0   :  { %8 = vsyncpa [#allocation3], 0  ;;  %s235_s0 = inlined_call_operand.hbm [shape: f32[32,128], index: 0, kind: input, shape index: {}]   ;;  %s236_s1 = inlined_call_operand.hbm [shape: f32[32,128], index: 1, kind: input, shape index: {}]   ;;  %s237_s2 = inlined_call_operand.vmem [shape: f32[1,128], index: 2, kind: input, shape index: {}]   ;;  %s238_s3 = inlined_call_operand.hbm [shape: f32[1,128], index: 3, kind: output, shape index: {}]  }
   0x1   :  { %9 = vsyncpa [#allocation6], 0 }
   0x2   :  { %10 = vsyncpa [#allocation4], 0  ;;  %s15_s14 = sshll.u32 %s235_s0, 4  ;;  %s198_s15 = smov [#allocation2]   ;;  %s16_s14 = int_to_ptr.hbm [resolvable:$true] %s15_s14 }
   0x3   :  { %s17_s16 = sshll.u32 %s198_s15, 4  ;;  %s28_s19 = sshll.u32 %s236_s1, 4  ;;  %s18_s16 = int_to_ptr.vmem [resolvable:$true] %s17_s16  ;;  %s29_s19 = int_to_ptr.hbm [resolvable:$true] %s28_s19 }
   0x4   :  { %s199_s20 = smov 128   ;;  %s200_s21 = smov 8  }
   0x5   :  { %23 = dma.hbm_to_vmem [thread:$0]  %s16_s14, 512, %s18_s16, [#allocation3], %s199_s20, %s199_s20, %s200_s21  }
   0x6   :  { %s201_s22 = smov [#allocation5]  }
   0x7   :  { %s30_s23 = sshll.u32 %s201_s22, 4  ;;  %s31_s23 = int_to_ptr.vmem [resolvable:$true] %s30_s23 }
   0x8   :  { %36 = dma.hbm_to_vmem [thread:$0]  %s29_s19, 512, %s31_s23, [#allocation6], %s199_s20, %s199_s20, %s200_s21  }
   0x9   :  { %192 = dma.done.wait [#allocation3], 512  }
   0xa   :  { %193 = vsyncadd [#allocation3], 4294966784 }
   0xb   :  { %194 = dma.done.wait [#allocation6], 512  }
   0xc   :  { %195 = vsyncadd [#allocation6], 4294966784  ;;  %v47_v0 = vld [vmem:[#allocation2] sm:$0xff]  ;;  %v48_v1 = vld [vmem:[#allocation2 + $0x8] sm:$0xff]  ;;  %s99_s27 = sshll.u32 %s238_s3, 4  ;;  %s100_s27 = int_to_ptr.hbm [resolvable:$true] %s99_s27 }
   0xd   :  { %v49_v2 = vld [vmem:[#allocation2 + $0x10] sm:$0xff]  ;;  %v50_v3 = vld [vmem:[#allocation2 + $0x18] sm:$0xff]  ;;  %v51_v4 = vld [vmem:[#allocation5] sm:$0xff] }
   0xe   :  { %v52_v5 = vld [vmem:[#allocation5 + $0x8] sm:$0xff]  ;;  %v53_v6 = vld [vmem:[#allocation5 + $0x10] sm:$0xff]  ;;  %v54_v7 = vld [vmem:[#allocation5 + $0x18] sm:$0xff]  ;;  %v55_v8 = vmul.f32 %v51_v4, %v47_v0 }
   0xf   :  { %v56_v9 = vmul.f32 %v52_v5, %v48_v1  ;;  %v57_v10 = vmul.f32 %v53_v6, %v49_v2  ;;  %v58_v11 = vmul.f32 %v54_v7, %v50_v3  ;;  %v68_v20 = vld [vmem:[%s237_s2] sm:$0x1]  ;;  %s202_s2 = smov [#allocation7]  }
  0x10   :  { %s97_s24 = sshll.u32 %s202_s2, 4  ;;  %s98_s24 = int_to_ptr.vmem [resolvable:$true] %s97_s24 }
  0x11   :  { %v59_v12 = vadd.f32 %v56_v9, %v55_v8 }
  0x13   :  { %v60_v13 = vadd.f32 %v59_v12, %v57_v10 }
  0x15   :  { %v61_v14 = vadd.f32 %v60_v13, %v58_v11 }
  0x17   :  { %v62_v15 = vrot.slane %v61_v14, 4 }
  0x19   :  { %v63_v16 = vadd.f32 %v62_v15, %v61_v14 }
  0x1b   :  { %v64_v17 = vrot.slane %v63_v16, 2 }
  0x1d   :  { %v65_v18 = vadd.f32 %v64_v17, %v63_v16 }
  0x1f   :  { %v66_v19 = vrot.slane %v65_v18, 1 }
  0x21   :  { %v67_v21 = vadd.f32 %v66_v19, %v65_v18 }
  0x23   :  { %v69_v22 = vadd.f32 %v68_v20, %v67_v21 }
  0x25   :  { %v110_v23 = vmul.f32 -1.442695, %v69_v22 }
  0x27   :  { %116 = vpow2.f32 %v110_v23 }
  0x2d   :  { %v117_v24 = vpop.eup %116 }
  0x2e   :  { %v73_v25 = vadd.f32 1.0, %v117_v24 }
  0x30   :  { %118 = vrcp.f32 %v73_v25  ;;  %v85_v28 = vand.u32 2147483648, %v73_v25  ;;  %vm79_vm0 = vweird.f32 %v73_v25  ;;  %v83_v30 = vand.u32 2147483647, %v73_v25 }
  0x32   :  { %v86_v32 = vor.u32 1.1754944e-38, %v85_v28  ;;  %vm84_vm3 = vcmp.eq.f32.partialorder %v83_v30, 8.507059e+37 }
  0x36   :  { %v119_v26 = vpop.eup %118 }
  0x37   :  { %v75_v27 = vmul.f32 %v119_v26, %v73_v25  ;;  %vm80_vm1 = vweird.f32 %v119_v26 }
  0x38   :  { %vm81_vm2 = vmor %vm79_vm0, %vm80_vm1 }
  0x39   :  { %v76_v29 = vsub.f32 1.0, %v75_v27 }
  0x3b   :  { %v77_v31 = vmul.f32 %v119_v26, %v76_v29 }
  0x3d   :  { %v78_v33 = vadd.f32 %v119_v26, %v77_v31 }
  0x3f   :  { %v82_v34 = vsel %vm81_vm2, %v119_v26, %v78_v33 }
  0x40   :  { %v87_v35 = vsel %vm84_vm3, %v86_v32, %v82_v34 }
  0x41   :  { %v89_v36 = vmul.f32 5.5, %v87_v35 }
  0x43   :  { %91 = vst [vmem:[#allocation7] sm:$0x1] %v89_v36 }
  0x44   :  { %102 = dma.vmem_to_hbm [thread:$0]  %s98_s24, 16, %s100_s27, [#allocation4]  }
  0x45   :  { %196 = dma.done.wait [#allocation4], 16  }
  0x46   :  { %197 = vsyncadd [#allocation4], 4294967280 }
  0x47   :  { %107 = vsyncpa [#allocation3], 1 }
  0x48   :  { %108 = vsyncpa [#allocation6], 1 }
  0x49   :  { %109 = vsyncpa [#allocation4], 1 }

</bundles_post_ra>
